<compile_context>
chip_gen: v7x
topology: tpu7x:2x2x1
jax: 0.10.0
libtpu: 0.0.40
codegen_flags: <defaults>
</compile_context>

<pallas_src>
import jax
import jax.numpy as jnp
from jax.experimental import pallas as pl
from jax.experimental.pallas import tpu as pltpu

LANES = 128
ROW_ALIGN_BF16 = 16     # bf16 packs 2 rows per sublane -> 16-row granularity
TILE_N_LARGE = 1024     # input_dim <= 2048
TILE_N_SMALL = 512      # input_dim  > 2048 (keep double-buffered x tile modest)


def _round_up(x, m):
    return ((x + m - 1) // m) * m


def _choose_tile_n(n, input_dim):
    cap = TILE_N_LARGE if input_dim <= 2048 else TILE_N_SMALL
    if n > cap:
        return cap
    # Small-N case: try to emit >= 2 grid steps so the "parallel" axis can be
    # sharded across both v7x TensorCores; tiles stay 16-aligned for bf16.
    if n > 2 * ROW_ALIGN_BF16:
        half = _round_up(-(-n // 2), ROW_ALIGN_BF16)
        if half < n:
            return half
    # Single block covering the full row extent (block dim == array dim is
    # always a legal tiling, even when unaligned).
    return n


def _head_kernel(x_ref, w1_ref, b1_ref, w2_ref, b2_ref, o_ref):
    # x_ref:  [tile_n, input_dim]   bf16  (row-tiled, double-buffered)
    # w1_ref: [input_dim, inner_dim] bf16 (resident, single-buffered)
    # b1_ref: [1, inner_dim]         f32
    # w2_ref: [inner_dim, nc_pad]    bf16 (num_classes padded to 128 lanes)
    # b2_ref: [1, nc_pad]            f32
    # o_ref:  [tile_n, nc_pad]
    #
    # Dropout is the identity in eval/inference mode.
    # TODO(synk): training-mode dropout (pltpu.prng_seed / prng_random_bits).
    h = jnp.dot(x_ref[...], w1_ref[...], preferred_element_type=jnp.float32)
    h = jnp.tanh((h + b1_ref[...]).astype(jnp.bfloat16))   # bf16 tanh (EUP)
    out = jnp.dot(h, w2_ref[...], preferred_element_type=jnp.float32)
    o_ref[...] = (out + b2_ref[...]).astype(o_ref.dtype)


@jax.jit
def bart_classification_head(hidden_states, w1, b1, w2, b2):
    """hidden_states: [..., input_dim] -> [..., num_classes] (input dtype)."""
    orig_shape = hidden_states.shape
    input_dim = orig_shape[-1]
    inner_dim = w1.shape[1]
    num_classes = w2.shape[1]
    out_dtype = hidden_states.dtype

    # x is the dominant HBM stream: keep it bf16.  Callers should hand the
    # kernel bf16 activations directly so this cast is a no-op.
    x2d = hidden_states.reshape(-1, input_dim)
    if x2d.dtype != jnp.bfloat16:
        x2d = x2d.astype(jnp.bfloat16)
    n = x2d.shape[0]

    tile_n = _choose_tile_n(n, input_dim)
    grid = (pl.cdiv(n, tile_n),)   # ragged trailing block; no jnp.pad pass

    # Pad tiny num_classes up to a full 128-lane width -> lane-dense stores.
    nc_pad = _round_up(num_classes, LANES)
    w2p = jnp.pad(w2, ((0, 0), (0, nc_pad - num_classes)))
    b2p = jnp.pad(b2, ((0, nc_pad - num_classes),))

    # Weights in bf16 (native MXU input), biases in f32.
    w1_bf = w1.astype(jnp.bfloat16)
    w2_bf = w2p.astype(jnp.bfloat16)
    b1_2d = b1.reshape(1, inner_dim).astype(jnp.float32)
    b2_2d = b2p.reshape(1, nc_pad).astype(jnp.float32)

    # Scoped-VMEM budget sized from the working set (+50% headroom):
    # 2x bf16 x tile + 2x out tile + single-buffered bf16 weights + f32 biases
    # + ~2x the [tile_n, inner_dim] f32/bf16 intermediates.
    out_itemsize = jnp.dtype(out_dtype).itemsize
    working_set = (
        2 * tile_n * input_dim * 2
        + 2 * tile_n * nc_pad * out_itemsize
        + (input_dim * inner_dim + inner_dim * nc_pad) * 2
        + (inner_dim + nc_pad) * 4
        + 2 * tile_n * inner_dim * (4 + 2)
    )
    vmem_limit = int(working_set * 1.5) + (2 << 20)
    vmem_limit = max(16 << 20, min(vmem_limit, 48 << 20))

    out = pl.pallas_call(
        _head_kernel,
        out_shape=jax.ShapeDtypeStruct((n, nc_pad), out_dtype),
        grid=grid,
        in_specs=[
            # x: row-tiled, default double-buffered pipeline.
            pl.BlockSpec((tile_n, input_dim), lambda i: (i, 0)),
            # Weights/biases: constant index_map -> resident; single-buffered.
            pl.BlockSpec((input_dim, inner_dim), lambda i: (0, 0),
                         pipeline_mode=pl.Buffered(1)),
            pl.BlockSpec((1, inner_dim), lambda i: (0, 0),
                         pipeline_mode=pl.Buffered(1)),
            pl.BlockSpec((inner_dim, nc_pad), lambda i: (0, 0),
                         pipeline_mode=pl.Buffered(1)),
            pl.BlockSpec((1, nc_pad), lambda i: (0, 0),
                         pipeline_mode=pl.Buffered(1)),
        ],
        out_specs=pl.BlockSpec((tile_n, nc_pad), lambda i: (i, 0)),
        compiler_params=pltpu.CompilerParams(
            dimension_semantics=("parallel",),   # megacore sharding on v7x
            vmem_limit_bytes=vmem_limit),
    )(x2d, w1_bf, b1_2d, w2_bf, b2_2d)

    # Column slice-back from the lane-padded slab; XLA fuses this with the
    # reshape (no standalone row-pad/row-slice passes remain).
    out = out[:, :num_classes]
    return out.reshape(*orig_shape[:-1], num_classes)


if __name__ == "__main__":
    # Small shapes consistent with the module.
    batch, seq = 2, 8
    input_dim, inner_dim, num_classes = 32, 32, 8

    key = jax.random.PRNGKey(0)
    k_x, k_w1, k_b1, k_w2, k_b2 = jax.random.split(key, 5)

    # Activations in bf16 (model compute dtype): the kernel's x stream is
    # half-width and no wrapper-side cast pass runs.
    x = jax.random.normal(
        k_x, (batch, seq, input_dim), dtype=jnp.float32).astype(jnp.bfloat16)
    # Parameters stored as [in, out] (pre-transposed vs. PyTorch nn.Linear).
    w1 = jax.random.normal(k_w1, (input_dim, inner_dim), dtype=jnp.float32) * 0.02
    b1 = jax.random.normal(k_b1, (inner_dim,), dtype=jnp.float32) * 0.02
    w2 = jax.random.normal(k_w2, (inner_dim, num_classes), dtype=jnp.float32) * 0.02
    b2 = jax.random.normal(k_b2, (num_classes,), dtype=jnp.float32) * 0.02

    out = bart_classification_head(x, w1, b1, w2, b2)
    out = jax.block_until_ready(out)

    # Pure-JAX f32 reference (dropout = identity in eval mode). Tolerance is
    # widened because the kernel runs bf16 matmul inputs/weights.
    xf = x.astype(jnp.float32)
    ref = jnp.tanh(xf @ w1 + b1) @ w2 + b2
    assert out.shape == (batch, seq, num_classes)
    assert out.dtype == x.dtype
    err = jnp.max(jnp.abs(out.astype(jnp.float32) - ref))
    assert jnp.allclose(out.astype(jnp.float32), ref, atol=3e-2, rtol=3e-2), \
        f"max abs err {err}"

    print("KERNEL_OK")
</pallas_src>

<mosaic_0001>
module attributes {stable_mosaic.version = 11 : i64} {
  func.func @_head_kernel(%arg0: i32, %arg1: memref<16x32xbf16, #tpu.memory_space<vmem>>, %arg2: memref<32x32xbf16, #tpu.memory_space<vmem>>, %arg3: memref<1x32xf32, #tpu.memory_space<vmem>>, %arg4: memref<32x128xbf16, #tpu.memory_space<vmem>>, %arg5: memref<1x128xf32, #tpu.memory_space<vmem>>, %arg6: memref<16x128xbf16, #tpu.memory_space<vmem>>) attributes {dimension_semantics = [#tpu.dimension_semantics<parallel>], iteration_bounds = array<i64: 1>, scalar_prefetch = 0 : i64, scratch_operands = 0 : i64, tpu.core_type = #tpu.core_type<tc>, window_params = [{transform_indices = @transform_0, window_bounds = array<i64: 16, 32>}, {pipeline_mode = #tpu.pipeline_mode<synchronous>, transform_indices = @transform_1, window_bounds = array<i64: 32, 32>}, {pipeline_mode = #tpu.pipeline_mode<synchronous>, transform_indices = @transform_2, window_bounds = array<i64: 1, 32>}, {pipeline_mode = #tpu.pipeline_mode<synchronous>, transform_indices = @transform_3, window_bounds = array<i64: 32, 128>}, {pipeline_mode = #tpu.pipeline_mode<synchronous>, transform_indices = @transform_4, window_bounds = array<i64: 1, 128>}, {transform_indices = @transform_5, window_bounds = array<i64: 16, 128>}]} {
    %c0 = arith.constant 0 : index
    %c0_0 = arith.constant 0 : index
    %0 = vector.load %arg1[%c0, %c0_0] : memref<16x32xbf16, #tpu.memory_space<vmem>>, vector<16x32xbf16>
    %c0_1 = arith.constant 0 : index
    %c0_2 = arith.constant 0 : index
    %1 = vector.load %arg2[%c0_1, %c0_2] : memref<32x32xbf16, #tpu.memory_space<vmem>>, vector<32x32xbf16>
    %cst = arith.constant dense<0.000000e+00> : vector<16x32xf32>
    %2 = tpu.matmul %0, %1, %cst {dimension_numbers = #tpu.dot_dimension_numbers<[1], [0], [0], [1], [0, 0, 1, 1], [], []>} : vector<16x32xbf16>, vector<32x32xbf16>, vector<16x32xf32> -> vector<16x32xf32>
    %c0_3 = arith.constant 0 : index
    %c0_4 = arith.constant 0 : index
    %3 = vector.load %arg3[%c0_3, %c0_4] : memref<1x32xf32, #tpu.memory_space<vmem>>, vector<1x32xf32>
    %4 = vector.broadcast %3 : vector<1x32xf32> to vector<16x32xf32>
    %5 = arith.addf %2, %4 : vector<16x32xf32>
    %6 = arith.truncf %5 : vector<16x32xf32> to vector<16x32xbf16>
    %7 = math.tanh %6 : vector<16x32xbf16>
    %c0_5 = arith.constant 0 : index
    %c0_6 = arith.constant 0 : index
    %8 = vector.load %arg4[%c0_5, %c0_6] : memref<32x128xbf16, #tpu.memory_space<vmem>>, vector<32x128xbf16>
    %cst_7 = arith.constant dense<0.000000e+00> : vector<16x128xf32>
    %9 = tpu.matmul %7, %8, %cst_7 {dimension_numbers = #tpu.dot_dimension_numbers<[1], [0], [0], [1], [0, 0, 1, 1], [], []>} : vector<16x32xbf16>, vector<32x128xbf16>, vector<16x128xf32> -> vector<16x128xf32>
    %c0_8 = arith.constant 0 : index
    %c0_9 = arith.constant 0 : index
    %10 = vector.load %arg5[%c0_8, %c0_9] : memref<1x128xf32, #tpu.memory_space<vmem>>, vector<1x128xf32>
    %11 = vector.broadcast %10 : vector<1x128xf32> to vector<16x128xf32>
    %12 = arith.addf %9, %11 : vector<16x128xf32>
    %13 = arith.truncf %12 : vector<16x128xf32> to vector<16x128xbf16>
    %c0_10 = arith.constant 0 : index
    %c0_11 = arith.constant 0 : index
    %14 = vector.load %arg6[%c0_10, %c0_11] : memref<16x128xbf16, #tpu.memory_space<vmem>>, vector<16x128xbf16>
    tpu.vector_store %arg6[%c0_10, %c0_11], %13 {strides = array<i32>} : memref<16x128xbf16, #tpu.memory_space<vmem>>, vector<16x128xbf16>,
    return
  }
  func.func @transform_0(%arg0: i32) -> (i32, i32) {
    %c0_i32 = arith.constant 0 : i32
    %c0_i32_0 = arith.constant 0 : i32
    return %arg0, %c0_i32 : i32, i32
  }
  func.func @transform_1(%arg0: i32) -> (i32, i32) {
    %c0_i32 = arith.constant 0 : i32
    %c0_i32_0 = arith.constant 0 : i32
    %c0_i32_1 = arith.constant 0 : i32
    return %c0_i32, %c0_i32_0 : i32, i32
  }
  func.func @transform_2(%arg0: i32) -> (i32, i32) {
    %c0_i32 = arith.constant 0 : i32
    %c0_i32_0 = arith.constant 0 : i32
    %c0_i32_1 = arith.constant 0 : i32
    return %c0_i32, %c0_i32_0 : i32, i32
  }
  func.func @transform_3(%arg0: i32) -> (i32, i32) {
    %c0_i32 = arith.constant 0 : i32
    %c0_i32_0 = arith.constant 0 : i32
    %c0_i32_1 = arith.constant 0 : i32
    return %c0_i32, %c0_i32_0 : i32, i32
  }
  func.func @transform_4(%arg0: i32) -> (i32, i32) {
    %c0_i32 = arith.constant 0 : i32
    %c0_i32_0 = arith.constant 0 : i32
    %c0_i32_1 = arith.constant 0 : i32
    return %c0_i32, %c0_i32_0 : i32, i32
  }
  func.func @transform_5(%arg0: i32) -> (i32, i32) {
    %c0_i32 = arith.constant 0 : i32
    %c0_i32_0 = arith.constant 0 : i32
    return %arg0, %c0_i32 : i32, i32
  }
}

</mosaic_0001>

<bundles_post_ra>
// kernel: bart_classification_head.1
= control target key start
LH: loop header
LB: loop body
LE: loop exit
PB: predicated region body
PF: predicated region fallthrough
CT: control target
= control target key end

     0   :  { %v228_v0 = vmov 0.0   ;;  %vm229_vm0 = vmmov 0   ;;  %vm51_vm1 = vcmask 261120   ;;  %s286_s1 = inlined_call_operand.vmem [shape: bf16[32,32], index: 1, kind: input, shape index: {}]   ;;  %s287_s0 = inlined_call_operand.vmem [shape: bf16[16,32], index: 0, kind: input, shape index: {}]   ;;  %s288_s3 = inlined_call_operand.vmem [shape: bf16[32,128], index: 3, kind: input, shape index: {}]   ;;  %s289_s2 = inlined_call_operand.vmem [shape: f32[1,32], index: 2, kind: input, shape index: {}]   ;;  %s290_s4 = inlined_call_operand.vmem [shape: f32[1,128], index: 4, kind: input, shape index: {}]   ;;  %s291_s5 = inlined_call_operand.vmem [shape: bf16[16,128], index: 5, kind: output, shape index: {}]  }
   0x1   :  { %203 = vmatprep.subr.bf16.mxu0 %v228_v0  ;;  %v221_v1 = vld [vmem:[%s286_s1] sm:$0xff]   ;;  %207 = vmatprep.mubr.msk.bf16.mxu0 %vm229_vm0, %v228_v0  ;;  %v222_v2 = vld [vmem:[%s286_s1 + $0x8] sm:$0xff]  }
   0x2   :  { %211 = vmatprep.subr.bf16.mxu1 %v228_v0  ;;  %215 = vmatprep.mubr.msk.bf16.mxu1 %vm229_vm0, %v228_v0  ;;  %v223_v3 = vld [vmem:[%s287_s0] sm:$0xff]   ;;  %v225_v5 = vld [vmem:[%s288_s3 + $0x8] sm:$0xff]  }
   0x3   :  { %204 = vmatpush3.bf16.msra.mxu0 %v221_v1  ;;  %v224_v4 = vld [vmem:[%s288_s3] sm:$0xff]  }
   0x4   :  { %205 = vmatprep.subr.bf16.mxu0 %v228_v0  ;;  %212 = vmatpush3.bf16.msra.mxu1 %v224_v4  ;;  %v179_v6 = vld [vmem:[%s289_s2] ss:$0 sm:$0xff] }
   0x5   :  { %213 = vmatprep.subr.bf16.mxu1 %v228_v0  ;;  %v184_v15 = vld [vmem:[%s290_s4] ss:$0 sm:$0xff] }
   0x7   :  { %206 = vmatpush3.bf16.msra.mxu0 %v222_v2 }
   0x8   :  { %214 = vmatpush3.bf16.msra.mxu1 %v225_v5 }
   0xa   :  { %208 = vmatmul.mubr.msk.bf16.vlgmr.msra.gmra.mrb[0].mxu0 %vm51_vm1, %v223_v3 }
  0xdd   :  { %v89_v7 = vpop.f32.mrb[0].mxu0 }
  0xde   :  { %v209_v8 = vpop.f32.mrb[1].mxu0  ;;  %v90_v10 = vadd.f32 %v179_v6, %v89_v7 }
  0xdf   :  { %v92_v9 = vpop.f32.mrb[2].mxu0 }
  0xe0   :  { %v93_v11 = vadd.f32 %v179_v6, %v92_v9  ;;  %v210_v12 = vpop.f32.mrb[3].mxu0 }
  0xe2   :  { %v96_v13 = vpack.c.bf16 %v93_v11, %v90_v10 }
  0xe4   :  { %226 = vtanh.bf16 %v96_v13 }
  0xef   :  { %v227_v14 = vpop.eup %226 }
  0xf0   :  { %216 = vmatmul.mubr.msk.bf16.vlgmr.msra.gmra.mrb[0].mxu1 %vm51_vm1, %v227_v14 }
 0x1c3   :  { %v158_v16 = vpop.f32.mrb[0].mxu1 }
 0x1c4   :  { %v217_v17 = vpop.f32.mrb[1].mxu1  ;;  %v159_v19 = vadd.f32 %v184_v15, %v158_v16 }
 0x1c5   :  { %v161_v18 = vpop.f32.mrb[2].mxu1 }
 0x1c6   :  { %v162_v20 = vadd.f32 %v184_v15, %v161_v18  ;;  %v218_v21 = vpop.f32.mrb[3].mxu1 }
 0x1c8   :  { %v195_v22 = vpack.c.bf16 %v162_v20, %v159_v19 }
 0x1ca   :  { %196 = vst [vmem:[%s291_s5] sm:$0xff] %v195_v22  }

</bundles_post_ra>
